<compile_context>
chip_gen: v7x
topology: tpu7x:2x2x1
jax: 0.10.0
libtpu: 0.0.40
codegen_flags: <defaults>
</compile_context>

<pallas_src>
import jax
import jax.numpy as jnp
from jax.experimental import pallas as pl
from jax.experimental.pallas import tpu as pltpu


def _prediction_net_kernel(tok_ref, table_ref, w_ref, b_ref, out_ref, emb_ref):
    """One grid step over a tile of TN tokens.

    tok_ref   : (N_pad,)  int32     all token ids, scalar-prefetched to SMEM
    table_ref : (V, E)    float32   embedding table, fully resident in VMEM
    w_ref     : (E, E)    f32/bf16  projection weight in PyTorch (out, in) layout
    b_ref     : (1, E)    float32   projection bias
    out_ref   : (TN, E)   float32   projected embeddings for this tile
    emb_ref   : (TN, E)   float32   VMEM scratch holding the gathered rows
    """
    tile_n = out_ref.shape[0]
    vocab = table_ref.shape[0]
    base = pl.program_id(0) * tile_n

    def gather_row(j, carry):
        # Scalar path: SMEM id read + clamp.  (PyTorch nn.Embedding would raise
        # on OOB ids; clamping keeps padded / bad ids from reading off-table.)
        tok = tok_ref[base + j]
        tok = jnp.clip(tok, 0, vocab - 1)
        emb_ref[pl.ds(j, 1), :] = table_ref[pl.ds(tok, 1), :]
        return carry

    jax.lax.fori_loop(0, tile_n, gather_row, 0, unroll=8)

    # Projection: y = x @ W^T + b, contracting the "in" dims directly so the
    # weight never needs a transposed copy.  fp32 accumulation on the MXU.
    x = emb_ref[...].astype(w_ref.dtype)
    projected = jax.lax.dot_general(
        x, w_ref[...],
        dimension_numbers=(((1,), (1,)), ((), ())),
        preferred_element_type=jnp.float32)
    out_ref[...] = (projected + b_ref[...]).astype(out_ref.dtype)


def _round_up(x, m):
    return (x + m - 1) // m * m


def stateless_prediction_net(tokens, table, weight, bias, *,
                             tile_n=256, compute_dtype=None):
    """JAX/Pallas forward matching the PyTorch module.

    tokens : (B, U) int32
    table  : (V, E) float32   nn.Embedding.weight
    weight : (E, E) float32   nn.Linear.weight  (out, in) — NOT transposed
    bias   : (E,)   float32   nn.Linear.bias
    returns (B, U, E) float32
    """
    B, U = tokens.shape
    V, E = table.shape
    N = B * U

    # Tile the token axis: multiple of 8 (sublanes), default 256, but small
    # enough that the grid has >= 2 steps whenever N allows it (software
    # pipelining + v7x dual-TensorCore sharding of the "parallel" axis).
    tile_n = _round_up(min(tile_n, max(8, _round_up(N, 8) // 2)), 8)
    n_pad = _round_up(N, tile_n)
    grid = (n_pad // tile_n,)

    tok_flat = tokens.reshape(N).astype(jnp.int32)
    if n_pad != N:
        tok_flat = jnp.pad(tok_flat, (0, n_pad - N))
    if compute_dtype is not None and compute_dtype != weight.dtype:
        weight = weight.astype(compute_dtype)   # one-time cast, layout unchanged
    b2 = bias.reshape(1, E)

    itemsize_t = table.dtype.itemsize
    itemsize_w = weight.dtype.itemsize
    flops = 2 * n_pad * E * E
    bytes_accessed = (4 * n_pad + V * E * itemsize_t + E * E * itemsize_w
                      + E * 4 + n_pad * E * 4)
    # VMEM budget: double-buffered constants + double-buffered output tile +
    # gather scratch, with generous headroom.
    vmem_need = (2 * V * E * itemsize_t + 2 * E * E * itemsize_w
                 + 3 * tile_n * E * 4 + 2 * E * 4)
    vmem_limit = int(min(max(2 * vmem_need + (4 << 20), 32 << 20), 100 << 20))

    out_flat = pl.pallas_call(
        _prediction_net_kernel,
        out_shape=jax.ShapeDtypeStruct((n_pad, E), jnp.float32),
        grid_spec=pltpu.PrefetchScalarGridSpec(
            num_scalar_prefetch=1,            # token ids land in SMEM
            grid=grid,
            in_specs=[
                # Constant (grid-invariant) operands: DMA'd once, stay resident.
                # TODO(synk): at production vocab sizes on v7x, single-buffer
                # these (pipeline_mode=pl.Buffered(1)) to halve their VMEM.
                pl.BlockSpec((V, E), lambda i, tok: (0, 0)),
                pl.BlockSpec((E, E), lambda i, tok: (0, 0)),
                pl.BlockSpec((1, E), lambda i, tok: (0, 0)),
            ],
            out_specs=pl.BlockSpec((tile_n, E), lambda i, tok: (i, 0)),
            scratch_shapes=[pltpu.VMEM((tile_n, E), jnp.float32)],
        ),
        compiler_params=pltpu.CompilerParams(
            dimension_semantics=("parallel",),
            vmem_limit_bytes=vmem_limit),
        cost_estimate=pl.CostEstimate(
            flops=flops, transcendentals=0, bytes_accessed=bytes_accessed),
    )(tok_flat, table, weight, b2)

    return out_flat[:N].reshape(B, U, E)


def init_params(key, vocab_size, embed_dim):
    """Deterministic init mirroring the PyTorch module's parameter shapes."""
    k_emb, k_w, k_b = jax.random.split(key, 3)
    # nn.Embedding default: N(0, 1)
    table = jax.random.normal(k_emb, (vocab_size, embed_dim), dtype=jnp.float32)
    # nn.Linear default: U(-1/sqrt(in), 1/sqrt(in))
    bound = 1.0 / jnp.sqrt(embed_dim)
    weight = jax.random.uniform(k_w, (embed_dim, embed_dim),
                                minval=-bound, maxval=bound, dtype=jnp.float32)
    bias = jax.random.uniform(k_b, (embed_dim,),
                              minval=-bound, maxval=bound, dtype=jnp.float32)
    return table, weight, bias


if __name__ == "__main__":
    vocab_size = 32
    embed_dim = 256          # module default
    B, U = 2, 8              # N = 16 -> tile_n = 8, grid of 2 steps

    key = jax.random.PRNGKey(0)
    k_params, k_tok = jax.random.split(key)
    table, weight, bias = init_params(k_params, vocab_size, embed_dim)
    tokens = jax.random.randint(k_tok, (B, U), 0, vocab_size, dtype=jnp.int32)

    fwd = jax.jit(stateless_prediction_net)
    out = jax.block_until_ready(fwd(tokens, table, weight, bias))

    # Pure-JAX reference for correctness.
    ref = jnp.take(table, tokens, axis=0) @ weight.T + bias
    assert out.shape == (B, U, embed_dim)
    assert jnp.allclose(out, ref, atol=1e-5, rtol=1e-5), "mismatch vs reference"

    print("KERNEL_OK")
</pallas_src>

<mosaic_0001>
module attributes {stable_mosaic.version = 11 : i64} {
  func.func @_prediction_net_kernel(%arg0: i32, %arg1: memref<16xi32, #tpu.memory_space<smem>>, %arg2: memref<32x256xf32, #tpu.memory_space<vmem>>, %arg3: memref<256x256xf32, #tpu.memory_space<vmem>>, %arg4: memref<1x256xf32, #tpu.memory_space<vmem>>, %arg5: memref<8x256xf32, #tpu.memory_space<vmem>>, %arg6: memref<8x256xf32, #tpu.memory_space<vmem>>) attributes {dimension_semantics = [#tpu.dimension_semantics<parallel>], iteration_bounds = array<i64: 2>, scalar_prefetch = 1 : i64, scratch_operands = 1 : i64, tpu.core_type = #tpu.core_type<tc>, window_params = [{pipeline_mode = #tpu.pipeline_mode<synchronous>, transform_indices = @transform_0, window_bounds = array<i64: 32, 256>}, {pipeline_mode = #tpu.pipeline_mode<synchronous>, transform_indices = @transform_1, window_bounds = array<i64: 256, 256>}, {pipeline_mode = #tpu.pipeline_mode<synchronous>, transform_indices = @transform_2, window_bounds = array<i64: 1, 256>}, {transform_indices = @transform_3, window_bounds = array<i64: 8, 256>}]} {
    %c8_i32 = arith.constant 8 : i32
    %0 = arith.muli %arg0, %c8_i32 : i32
    %c0_i32 = arith.constant 0 : i32
    %1 = arith.addi %0, %c0_i32 : i32
    %2 = arith.index_cast %1 : i32 to index
    %3 = memref.load %arg1[%2] : memref<16xi32, #tpu.memory_space<smem>>
    %c0_i32_0 = arith.constant 0 : i32
    %c31_i32 = arith.constant 31 : i32
    %4 = arith.maxsi %c0_i32_0, %3 : i32
    %5 = arith.minsi %c31_i32, %4 : i32
    %6 = arith.index_cast %5 : i32 to index
    %c0 = arith.constant 0 : index
    %7 = vector.load %arg2[%6, %c0] : memref<32x256xf32, #tpu.memory_space<vmem>>, vector<1x256xf32>
    %8 = arith.index_cast %c0_i32 : i32 to index
    %c0_1 = arith.constant 0 : index
    %9 = vector.load %arg6[%8, %c0_1] : memref<8x256xf32, #tpu.memory_space<vmem>>, vector<1x256xf32>
    tpu.vector_store %arg6[%8, %c0_1], %7 {strides = array<i32>} : memref<8x256xf32, #tpu.memory_space<vmem>>, vector<1x256xf32>,
    %c1_i32 = arith.constant 1 : i32
    %10 = arith.addi %0, %c1_i32 : i32
    %11 = arith.index_cast %10 : i32 to index
    %12 = memref.load %arg1[%11] : memref<16xi32, #tpu.memory_space<smem>>
    %c0_i32_2 = arith.constant 0 : i32
    %c31_i32_3 = arith.constant 31 : i32
    %13 = arith.maxsi %c0_i32_2, %12 : i32
    %14 = arith.minsi %c31_i32_3, %13 : i32
    %15 = arith.index_cast %14 : i32 to index
    %c0_4 = arith.constant 0 : index
    %16 = vector.load %arg2[%15, %c0_4] : memref<32x256xf32, #tpu.memory_space<vmem>>, vector<1x256xf32>
    %17 = arith.index_cast %c1_i32 : i32 to index
    %c0_5 = arith.constant 0 : index
    %18 = vector.load %arg6[%17, %c0_5] : memref<8x256xf32, #tpu.memory_space<vmem>>, vector<1x256xf32>
    tpu.vector_store %arg6[%17, %c0_5], %16 {strides = array<i32>} : memref<8x256xf32, #tpu.memory_space<vmem>>, vector<1x256xf32>,
    %c2_i32 = arith.constant 2 : i32
    %19 = arith.addi %0, %c2_i32 : i32
    %20 = arith.index_cast %19 : i32 to index
    %21 = memref.load %arg1[%20] : memref<16xi32, #tpu.memory_space<smem>>
    %c0_i32_6 = arith.constant 0 : i32
    %c31_i32_7 = arith.constant 31 : i32
    %22 = arith.maxsi %c0_i32_6, %21 : i32
    %23 = arith.minsi %c31_i32_7, %22 : i32
    %24 = arith.index_cast %23 : i32 to index
    %c0_8 = arith.constant 0 : index
    %25 = vector.load %arg2[%24, %c0_8] : memref<32x256xf32, #tpu.memory_space<vmem>>, vector<1x256xf32>
    %26 = arith.index_cast %c2_i32 : i32 to index
    %c0_9 = arith.constant 0 : index
    %27 = vector.load %arg6[%26, %c0_9] : memref<8x256xf32, #tpu.memory_space<vmem>>, vector<1x256xf32>
    tpu.vector_store %arg6[%26, %c0_9], %25 {strides = array<i32>} : memref<8x256xf32, #tpu.memory_space<vmem>>, vector<1x256xf32>,
    %c3_i32 = arith.constant 3 : i32
    %28 = arith.addi %0, %c3_i32 : i32
    %29 = arith.index_cast %28 : i32 to index
    %30 = memref.load %arg1[%29] : memref<16xi32, #tpu.memory_space<smem>>
    %c0_i32_10 = arith.constant 0 : i32
    %c31_i32_11 = arith.constant 31 : i32
    %31 = arith.maxsi %c0_i32_10, %30 : i32
    %32 = arith.minsi %c31_i32_11, %31 : i32
    %33 = arith.index_cast %32 : i32 to index
    %c0_12 = arith.constant 0 : index
    %34 = vector.load %arg2[%33, %c0_12] : memref<32x256xf32, #tpu.memory_space<vmem>>, vector<1x256xf32>
    %35 = arith.index_cast %c3_i32 : i32 to index
    %c0_13 = arith.constant 0 : index
    %36 = vector.load %arg6[%35, %c0_13] : memref<8x256xf32, #tpu.memory_space<vmem>>, vector<1x256xf32>
    tpu.vector_store %arg6[%35, %c0_13], %34 {strides = array<i32>} : memref<8x256xf32, #tpu.memory_space<vmem>>, vector<1x256xf32>,
    %c4_i32 = arith.constant 4 : i32
    %37 = arith.addi %0, %c4_i32 : i32
    %38 = arith.index_cast %37 : i32 to index
    %39 = memref.load %arg1[%38] : memref<16xi32, #tpu.memory_space<smem>>
    %c0_i32_14 = arith.constant 0 : i32
    %c31_i32_15 = arith.constant 31 : i32
    %40 = arith.maxsi %c0_i32_14, %39 : i32
    %41 = arith.minsi %c31_i32_15, %40 : i32
    %42 = arith.index_cast %41 : i32 to index
    %c0_16 = arith.constant 0 : index
    %43 = vector.load %arg2[%42, %c0_16] : memref<32x256xf32, #tpu.memory_space<vmem>>, vector<1x256xf32>
    %44 = arith.index_cast %c4_i32 : i32 to index
    %c0_17 = arith.constant 0 : index
    %45 = vector.load %arg6[%44, %c0_17] : memref<8x256xf32, #tpu.memory_space<vmem>>, vector<1x256xf32>
    tpu.vector_store %arg6[%44, %c0_17], %43 {strides = array<i32>} : memref<8x256xf32, #tpu.memory_space<vmem>>, vector<1x256xf32>,
    %c5_i32 = arith.constant 5 : i32
    %46 = arith.addi %0, %c5_i32 : i32
    %47 = arith.index_cast %46 : i32 to index
    %48 = memref.load %arg1[%47] : memref<16xi32, #tpu.memory_space<smem>>
    %c0_i32_18 = arith.constant 0 : i32
    %c31_i32_19 = arith.constant 31 : i32
    %49 = arith.maxsi %c0_i32_18, %48 : i32
    %50 = arith.minsi %c31_i32_19, %49 : i32
    %51 = arith.index_cast %50 : i32 to index
    %c0_20 = arith.constant 0 : index
    %52 = vector.load %arg2[%51, %c0_20] : memref<32x256xf32, #tpu.memory_space<vmem>>, vector<1x256xf32>
    %53 = arith.index_cast %c5_i32 : i32 to index
    %c0_21 = arith.constant 0 : index
    %54 = vector.load %arg6[%53, %c0_21] : memref<8x256xf32, #tpu.memory_space<vmem>>, vector<1x256xf32>
    tpu.vector_store %arg6[%53, %c0_21], %52 {strides = array<i32>} : memref<8x256xf32, #tpu.memory_space<vmem>>, vector<1x256xf32>,
    %c6_i32 = arith.constant 6 : i32
    %55 = arith.addi %0, %c6_i32 : i32
    %56 = arith.index_cast %55 : i32 to index
    %57 = memref.load %arg1[%56] : memref<16xi32, #tpu.memory_space<smem>>
    %c0_i32_22 = arith.constant 0 : i32
    %c31_i32_23 = arith.constant 31 : i32
    %58 = arith.maxsi %c0_i32_22, %57 : i32
    %59 = arith.minsi %c31_i32_23, %58 : i32
    %60 = arith.index_cast %59 : i32 to index
    %c0_24 = arith.constant 0 : index
    %61 = vector.load %arg2[%60, %c0_24] : memref<32x256xf32, #tpu.memory_space<vmem>>, vector<1x256xf32>
    %62 = arith.index_cast %c6_i32 : i32 to index
    %c0_25 = arith.constant 0 : index
    %63 = vector.load %arg6[%62, %c0_25] : memref<8x256xf32, #tpu.memory_space<vmem>>, vector<1x256xf32>
    tpu.vector_store %arg6[%62, %c0_25], %61 {strides = array<i32>} : memref<8x256xf32, #tpu.memory_space<vmem>>, vector<1x256xf32>,
    %c7_i32 = arith.constant 7 : i32
    %64 = arith.addi %0, %c7_i32 : i32
    %65 = arith.index_cast %64 : i32 to index
    %66 = memref.load %arg1[%65] : memref<16xi32, #tpu.memory_space<smem>>
    %c0_i32_26 = arith.constant 0 : i32
    %c31_i32_27 = arith.constant 31 : i32
    %67 = arith.maxsi %c0_i32_26, %66 : i32
    %68 = arith.minsi %c31_i32_27, %67 : i32
    %69 = arith.index_cast %68 : i32 to index
    %c0_28 = arith.constant 0 : index
    %70 = vector.load %arg2[%69, %c0_28] : memref<32x256xf32, #tpu.memory_space<vmem>>, vector<1x256xf32>
    %71 = arith.index_cast %c7_i32 : i32 to index
    %c0_29 = arith.constant 0 : index
    %72 = vector.load %arg6[%71, %c0_29] : memref<8x256xf32, #tpu.memory_space<vmem>>, vector<1x256xf32>
    tpu.vector_store %arg6[%71, %c0_29], %70 {strides = array<i32>} : memref<8x256xf32, #tpu.memory_space<vmem>>, vector<1x256xf32>,
    %c8_i32_30 = arith.constant 8 : i32
    %c0_31 = arith.constant 0 : index
    %c0_32 = arith.constant 0 : index
    %73 = vector.load %arg6[%c0_31, %c0_32] : memref<8x256xf32, #tpu.memory_space<vmem>>, vector<8x256xf32>
    %c0_33 = arith.constant 0 : index
    %c0_34 = arith.constant 0 : index
    %74 = vector.load %arg3[%c0_33, %c0_34] : memref<256x256xf32, #tpu.memory_space<vmem>>, vector<256x256xf32>
    %cst = arith.constant dense<0.000000e+00> : vector<8x256xf32>
    %75 = tpu.matmul %73, %74, %cst {dimension_numbers = #tpu.dot_dimension_numbers<[1], [1], [0], [0], [0, 0, 1, 0], [], []>} : vector<8x256xf32>, vector<256x256xf32>, vector<8x256xf32> -> vector<8x256xf32>
    %c0_35 = arith.constant 0 : index
    %c0_36 = arith.constant 0 : index
    %76 = vector.load %arg4[%c0_35, %c0_36] : memref<1x256xf32, #tpu.memory_space<vmem>>, vector<1x256xf32>
    %77 = vector.broadcast %76 : vector<1x256xf32> to vector<8x256xf32>
    %78 = arith.addf %75, %77 : vector<8x256xf32>
    %c0_37 = arith.constant 0 : index
    %c0_38 = arith.constant 0 : index
    %79 = vector.load %arg5[%c0_37, %c0_38] : memref<8x256xf32, #tpu.memory_space<vmem>>, vector<8x256xf32>
    tpu.vector_store %arg5[%c0_37, %c0_38], %78 {strides = array<i32>} : memref<8x256xf32, #tpu.memory_space<vmem>>, vector<8x256xf32>,
    return
  }
  func.func @transform_0(%arg0: i32, %arg1: memref<16xi32, #tpu.memory_space<smem>>) -> (i32, i32) {
    %c0_i32 = arith.constant 0 : i32
    %c0_i32_0 = arith.constant 0 : i32
    %c0_i32_1 = arith.constant 0 : i32
    return %c0_i32, %c0_i32_0 : i32, i32
  }
  func.func @transform_1(%arg0: i32, %arg1: memref<16xi32, #tpu.memory_space<smem>>) -> (i32, i32) {
    %c0_i32 = arith.constant 0 : i32
    %c0_i32_0 = arith.constant 0 : i32
    %c0_i32_1 = arith.constant 0 : i32
    return %c0_i32, %c0_i32_0 : i32, i32
  }
  func.func @transform_2(%arg0: i32, %arg1: memref<16xi32, #tpu.memory_space<smem>>) -> (i32, i32) {
    %c0_i32 = arith.constant 0 : i32
    %c0_i32_0 = arith.constant 0 : i32
    %c0_i32_1 = arith.constant 0 : i32
    return %c0_i32, %c0_i32_0 : i32, i32
  }
  func.func @transform_3(%arg0: i32, %arg1: memref<16xi32, #tpu.memory_space<smem>>) -> (i32, i32) {
    %c0_i32 = arith.constant 0 : i32
    %c0_i32_0 = arith.constant 0 : i32
    return %arg0, %c0_i32 : i32, i32
  }
}

</mosaic_0001>

<bundles_post_ra>
// kernel: stateless_prediction_net.1
= control target key start
LH: loop header
LB: loop body
LE: loop exit
PB: predicated region body
PF: predicated region fallthrough
CT: control target
= control target key end

     0   :  { %s1255_s0 = inlined_call_operand.vmem [shape: s32[16], index: 0, kind: input, shape index: {}]   ;;  %s1256_s1 = inlined_call_operand.hbm [shape: f32[32,256], index: 1, kind: input, shape index: {}]   ;;  %s1257_s2 = inlined_call_operand.hbm [shape: f32[256,256], index: 2, kind: input, shape index: {}]   ;;  %s1258_s3 = inlined_call_operand.vmem [shape: f32[1,256], index: 3, kind: input, shape index: {}]   ;;  %s1259_s4 = inlined_call_operand.hbm [shape: f32[16,256], index: 4, kind: output, shape index: {}]  }
   0x1   :  { %s9_s17 = sshll.u32 %s1255_s0, 4  ;;  %s10_s17 = int_to_ptr.vmem [resolvable:$true] %s9_s17 }
   0x2   :  { %s814_s18 = scalar_lea.vmem %s10_s17, 16  ;;  %p819_p1 = scmp.lt.s32.totalorder %s10_s17, %s10_s17 }
   0x3   :  { %p815_p0 = scmp.ne.s32.totalorder %s10_s17, %s814_s18  ;;  %p820_p2 = scmp.lt.s32.totalorder %s814_s18, %s814_s18 }
   0x5   :  { %p821_p3 = por %p820_p2, %p819_p1 }
   0x7   :  { %p822_p4 = pnand %p821_p3, %p815_p0 }
   0x9   :  { %825 = shalt.err (!%p822_p4)  }
   0xa   :  { %s956_s19 = smov [#allocation4]  }
   0xb   :  { %12 = dma.vmem_to_smem %s10_s17, 16, %s956_s19, [#allocation3] }
   0xc   :  { %926 = dma.done.wait [#allocation3], 16 }
   0xd   :  { %927 = vsyncadd [#allocation3], 4294967280 }
   0xe   :  { %14 = sfence }
   0xf   :  { %15 = vsyncpa [#allocation6], 0 }
  0x10   :  { %16 = vsyncpa [#allocation9], 0 }
  0x11   :  { %17 = vsyncpa [#allocation7], 0 }
  0x12   :  { %19 = vsyncpa [#allocation7 + $0x1], 0  ;;  %s990_s20 = smov 0   ;;  %s992_s0 = smov 0  }
  0x13   :  { %s994_s21 = smov 0   ;;  %s996_s22 = smov 0  }
  0x14 LB: > { %s1011_s23 = sadd.s32 4294967295, %s954_s22   ;;  %s592_s24 = sadd.s32 4294967294, %s954_s22   ;;  %s954_s22 = sphi %s996_s22, %s1279_s22   ;;  %s950_s21 = sphi %s994_s21, %s1278_s21   ;;  %s946_s0 = sphi %s992_s0, %s1277_s0   ;;  %s942_s20 = sphi %s990_s20, %s1276_s20  }
  0x15   : > { %s1015_s25 = sadd.s32 1, %s954_s22   ;;  %s95_s26 = sadd.s32 1, %s950_s21 }
  0x16   : > { %s92_s27 = ssub.s32 %s954_s22, %s1015_s25  ;;  %p105_p5 = scmp.ne.s32.totalorder %s950_s21, %s946_s0 }
  0x17   : > { %p93_p6 = scmp.eq.s32.totalorder %s92_s27, 0  ;;  %p106_p7 = scmp.eq.s32.totalorder %s1011_s23, 1 }
  0x18   : > { %p111_p8 = scmp.ne.s32.totalorder %s946_s0, %s942_s20  ;;  %p112_p9 = scmp.eq.s32.totalorder %s592_s24, 1 }
  0x19   : > { %s1026_s28 = scalar_select %p93_p6, %s950_s21, %s95_s26  }
  0x1a   : > { %p1028_p10 = por %p106_p7, %p105_p5  ;;  %p1032_p11 = por %p112_p9, %p111_p8 }
  0x1b   : > { %p593_p12 = scmp.ge.s32.totalorder %s954_s22, 1  ;;  %p119_p13 = scmp.lt.s32.totalorder %s954_s22, 3 }
  0x1c   : > { %s1263_s29 = scalar_select %p1028_p10, 1, 0 }
  0x1d   : > { %s1264_s30 = scalar_select %p1032_p11, 1, 0 }
  0x1e   : > { %p1260_p0 = scmp.eq.s32.totalorder %s1011_s23, 0  ;;  %p1039_p1 = pnand %p593_p12, %p119_p13 }
  0x1f   : > { %s957_s6 = smov [#allocation5]   ;;  %s958_s9 = smov [#allocation8]  }
  0x20   : > { %s1265_s5 = scalar_select %p1039_p1, 1, 0 }
  0x21   : > { %s131_s7 = sshll.u32 %s957_s6, 4  ;;  %p761_p2 = pneg %p1039_p1  ;;  %s132_s7 = int_to_ptr.vmem [resolvable:$true] %s131_s7 }
  0x22   : > { %s144_s10 = sshll.u32 %s958_s9, 4  ;;  %s826_s13 = scalar_lea.hbm %s1256_s1, 1024  ;;  %s1051_s10 = int_to_ptr.vmem [resolvable:$true] %s144_s10 }
  0x23   : > { %p1047_p3 = pnand %p1260_p0, %p761_p2  ;;  %p827_p4 = scmp.ne.s32.totalorder %s1256_s1, %s826_s13 }
  0x24   : > { %p833_p8 = scmp.lt.u32.totalorder %s826_s13, %s1256_s1 }
  0x25   : > { %p828_p5 = pneg %p1047_p3 }
  0x27   : > { %p829_p6 = pnand %p828_p5, %p827_p4 }
  0x29   : > { %p830_p7 = pneg %p829_p6 }
  0x2b   : > { %p835_p9 = pnand %p833_p8, %p830_p7 }
  0x2d   : > { %838 = shalt.err (!%p835_p9)
}
  0x2e   : > { %s839_s18 = scalar_lea.vmem %s132_s7, 1024  ;;  %p847_p0 = scmp.lt.s32.totalorder %s132_s7, %s132_s7 }
  0x2f   : > { %p840_p12 = scmp.ne.s32.totalorder %s132_s7, %s839_s18  ;;  %p848_p11 = scmp.lt.s32.totalorder %s839_s18, %s839_s18 }
  0x31   : > { %p842_p13 = pnand %p840_p12, %p828_p5  ;;  %p849_p10 = por %p848_p11, %p847_p0 }
  0x33   : > { %p843_p2 = pneg %p842_p13 }
  0x35   : > { %p850_p1 = pnand %p849_p10, %p843_p2 }
  0x37   : > { %853 = shalt.err (!%p850_p1)
}
  0x38   : > { %s959_s19 = smov 256   ;;  %s960_s24 = smov 16  }
  0x39   : > { %764 = dma.hbm_to_vmem [thread:$0]  (!%p1047_p3), %s1256_s1, 1024, %s132_s7, [#allocation6], %s959_s19, %s959_s19, %s960_s24  }
  0x3a   : > { %s854_s11 = scalar_lea.hbm %s1257_s2, 8192 }
  0x3b   : > { %p855_p4 = scmp.ne.s32.totalorder %s1257_s2, %s854_s11  ;;  %p861_p0 = scmp.lt.u32.totalorder %s854_s11, %s1257_s2 }
  0x3d   : > { %p857_p10 = pnand %p855_p4, %p828_p5 }
  0x3f   : > { %p858_p11 = pneg %p857_p10 }
  0x41   : > { %p863_p1 = pnand %p861_p0, %p858_p11 }
  0x43   : > { %866 = shalt.err (!%p863_p1)
}
  0x44   : > { %s867_s7 = scalar_lea.vmem %s1051_s10, 8192  ;;  %p875_p9 = scmp.lt.s32.totalorder %s1051_s10, %s1051_s10 }
  0x45   : > { %p868_p6 = scmp.ne.s32.totalorder %s1051_s10, %s867_s7  ;;  %p876_p12 = scmp.lt.s32.totalorder %s867_s7, %s867_s7 }
  0x47   : > { %p870_p7 = pnand %p868_p6, %p828_p5  ;;  %p877_p13 = por %p876_p12, %p875_p9 }
  0x49   : > { %p871_p8 = pneg %p870_p7 }
  0x4b   : > { %p878_p2 = pnand %p877_p13, %p871_p8 }
  0x4d   : > { %881 = shalt.err (!%p878_p2)
}
  0x4e   : > { %767 = dma.hbm_to_vmem [thread:$0]  (!%p1047_p3), %s1257_s2, 8192, %s1051_s10, [#allocation9], %s959_s19, %s959_s19, %s960_s24  }
  0x4f   : > { %p1267_p4 = scmp.ne.s32.totalorder %s1265_s5, 0 }
  0x50   : > { %p1268_p10 = scmp.eq.s32.totalorder (!%p1267_p4), %s1011_s23, 0 }
  0x51   : > { %163 = sbr.rel (%p1267_p4) target bundleno = 453 (0x1c5), region = 32 }
  0x58   : > { %929 = dma.done.wait (%p1268_p10), [#allocation6], 1024   ;;  %p1269_p5 = pmov %p1268_p10 }
  0x5a   : > { %931 = vsyncadd (%p1269_p5), [#allocation6], 4294966272  ;;  %p1270_p11 = pmov %p1269_p5 }
  0x5b   : > { %p1271_p0 = pmov %p1269_p5 }
  0x5c   : > { %933 = dma.done.wait (%p1270_p11), [#allocation9], 8192  }
  0x5d   : > { %935 = vsyncadd (%p1271_p0), [#allocation9], 4294959104  ;;  %s1111_s8 = sshll.u32 %s1011_s23, 3  ;;  %v336_v0 = vld [vmem:[#allocation8 + $0x8] sm:$0xff]  ;;  %v338_v1 = vld [vmem:[#allocation8 + $0x18] sm:$0xff]  ;;  %v201_v19 = vlaneseq }
  0x5e   : > { %s1114_s5 = sld [smem:[#allocation4 + %s1111_s8]]  ;;  %s207_s10 = sadd.s32 1, %s1111_s8  ;;  %v335_v2 = vld [vmem:[#allocation8] sm:$0xff]  ;;  %v687_v3 = vpack.c.bf16 %v338_v1, %v336_v0  ;;  %v337_v4 = vld [vmem:[#allocation8 + $0x10] sm:$0xff]  ;;  %v340_v5 = vld [vmem:[#allocation8 + $0x28] sm:$0xff] }
  0x5f   : > { %s1117_s18 = sld [smem:[#allocation4 + %s207_s10]]  ;;  %s225_s19 = sadd.s32 2, %s1111_s8  ;;  %v342_v6 = vld [vmem:[#allocation8 + $0x38] sm:$0xff]  ;;  %v689_v7 = vpack.c.bf16 %v337_v4, %v335_v2  ;;  %v339_v9 = vld [vmem:[#allocation8 + $0x20] sm:$0xff]  ;;  %v341_v10 = vld [vmem:[#allocation8 + $0x30] sm:$0xff]  ;;  %vm1151_vm0 = vcmp.lt.s32.totalorder %v201_v19, 256 }
  0x60   : > { %s1120_s24 = sld [smem:[#allocation4 + %s225_s19]]  ;;  %s243_s26 = sadd.s32 3, %s1111_s8  ;;  %v691_v8 = vpack.c.bf16 %v342_v6, %v340_v5  ;;  %688 = vmatprep.subr.bf16.mxu0 %v687_v3  ;;  %v344_v11 = vld [vmem:[#allocation8 + $0x48] sm:$0xff]  ;;  %v346_v12 = vld [vmem:[#allocation8 + $0x58] sm:$0xff]  ;;  %v693_v13 = vpack.c.bf16 %v341_v10, %v339_v9  ;;  %v343_v15 = vld [vmem:[#allocation8 + $0x40] sm:$0xff] }
  0x61   : > { %s1123_s27 = sld [smem:[#allocation4 + %s243_s26]]  ;;  %s261_s6 = sadd.s32 4, %s1111_s8  ;;  %690 = vmatpush1.bf16.xpose.msra.mxu0 %v689_v7  ;;  %v695_v14 = vpack.c.bf16 %v346_v12, %v344_v11  ;;  %v345_v16 = vld [vmem:[#allocation8 + $0x50] sm:$0xff]  ;;  %v348_v17 = vld [vmem:[#allocation8 + $0x68] sm:$0xff]  ;;  %v350_v18 = vld [vmem:[#allocation8 + $0x78] sm:$0xff] }
  0x62   : > { %s1126_s9 = sld [smem:[#allocation4 + %s261_s6]]  ;;  %s279_s11 = sadd.s32 5, %s1111_s8  ;;  %692 = vmatprep.subr.bf16.mxu0 %v691_v8  ;;  %v697_v20 = vpack.c.bf16 %v345_v16, %v343_v15  ;;  %v699_v21 = vpack.c.bf16 %v350_v18, %v348_v17  ;;  %v347_v23 = vld [vmem:[#allocation8 + $0x60] sm:$0xff]  ;;  %v349_v24 = vld [vmem:[#allocation8 + $0x70] sm:$0xff]  ;;  %v352_v25 = vld [vmem:[#allocation8 + $0x88] sm:$0xff] }
  0x63   : > { %s1129_s12 = sld [smem:[#allocation4 + %s279_s11]]  ;;  %s297_s13 = sadd.s32 6, %s1111_s8  ;;  %v354_v26 = vld [vmem:[#allocation8 + $0x98] sm:$0xff]  ;;  %v701_v30 = vpack.c.bf16 %v349_v24, %v347_v23  ;;  %v351_v33 = vld [vmem:[#allocation8 + $0x80] sm:$0xff]  ;;  %v353_v34 = vld [vmem:[#allocation8 + $0x90] sm:$0xff] }
  0x64   : > { %p188_p3 = scmp.gt.s32.totalorder %s1114_s5, 0  ;;  %p601_p1 = scmp.lt.s32.totalorder %s1114_s5, 31  ;;  %v703_v31 = vpack.c.bf16 %v354_v26, %v352_v25  ;;  %v356_v35 = vld [vmem:[#allocation8 + $0xa8] sm:$0xff]  ;;  %v358_v36 = vld [vmem:[#allocation8 + $0xb8] sm:$0xff]  ;;  %v705_v37 = vpack.c.bf16 %v353_v34, %v351_v33  ;;  %v355_v40 = vld [vmem:[#allocation8 + $0xa0] sm:$0xff] }
  0x65   : > { %p209_p6 = scmp.gt.s32.totalorder %s1117_s18, 0  ;;  %p608_p7 = scmp.lt.s32.totalorder %s1117_s18, 31  ;;  %v707_v38 = vpack.c.bf16 %v358_v36, %v356_v35  ;;  %v357_v41 = vld [vmem:[#allocation8 + $0xb0] sm:$0xff]  ;;  %v360_v42 = vld [vmem:[#allocation8 + $0xc8] sm:$0xff]  ;;  %v362_v43 = vld [vmem:[#allocation8 + $0xd8] sm:$0xff] }
  0x66   : > { %s1281_s5 = smov (!%p188_p3, %s1114_s5), 0  ;;  %p227_p8 = scmp.gt.s32.totalorder %s1120_s24, 0  ;;  %v709_v45 = vpack.c.bf16 %v357_v41, %v355_v40  ;;  %v711_v46 = vpack.c.bf16 %v362_v43, %v360_v42  ;;  %v359_v47 = vld [vmem:[#allocation8 + $0xc0] sm:$0xff]  ;;  %v361_v48 = vld [vmem:[#allocation8 + $0xd0] sm:$0xff]  ;;  %v364_v50 = vld [vmem:[#allocation8 + $0xe8] sm:$0xff] }
  0x67   : > { %s1283_s18 = smov (!%p209_p6, %s1117_s18), 0  ;;  %s1285_s5 = smov (!%p601_p1, %s1281_s5), 31  ;;  %v366_v51 = vld [vmem:[#allocation8 + $0xf8] sm:$0xff]  ;;  %v713_v52 = vpack.c.bf16 %v361_v48, %v359_v47  ;;  %v363_v55 = vld [vmem:[#allocation8 + $0xe0] sm:$0xff]  ;;  %v365_v56 = vld [vmem:[#allocation8 + $0xf0] sm:$0xff] }
  0x68   : > { %s1287_s18 = smov (!%p608_p7, %s1283_s18), 31  ;;  %s192_s14 = sshra.s32 %s1285_s5, 3  ;;  %v715_v53 = vpack.c.bf16 %v366_v51, %v364_v50  ;;  %v368_v57 = vld [vmem:[#allocation8 + $0x108] sm:$0xff]  ;;  %v370_v58 = vld [vmem:[#allocation8 + $0x118] sm:$0xff]  ;;  %v717_v59 = vpack.c.bf16 %v365_v56, %v363_v55  ;;  %v367_v62 = vld [vmem:[#allocation8 + $0x100] sm:$0xff] }
  0x69   : > { %s195_s15 = sand.u32 7, %s1285_s5  ;;  %s664_s7 = sshll.u32 %s192_s14, 4  ;;  %694 = vmatpush1.bf16.xpose.msra.mxu0 %v693_v13  ;;  %v719_v60 = vpack.c.bf16 %v370_v58, %v368_v57  ;;  %v369_v63 = vld [vmem:[#allocation8 + $0x110] sm:$0xff]  ;;  %v372_v0 = vld [vmem:[#allocation8 + $0x128] sm:$0xff]  ;;  %v374_v1 = vld [vmem:[#allocation8 + $0x138] sm:$0xff] }
  0x6a   : > { %s213_s16 = sshra.s32 %s1287_s18, 3  ;;  %s1138_s17 = sadd.s32 %s664_s7, %s195_s15  ;;  %696 = vmatprep.subr.bf16.mxu0 %v695_v14  ;;  %v721_v2 = vpack.c.bf16 %v369_v63, %v367_v62  ;;  %v723_v3 = vpack.c.bf16 %v374_v1, %v372_v0  ;;  %v371_v4 = vld [vmem:[#allocation8 + $0x120] sm:$0xff]  ;;  %v373_v5 = vld [vmem:[#allocation8 + $0x130] sm:$0xff]  ;;  %v376_v6 = vld [vmem:[#allocation8 + $0x148] sm:$0xff] }
  0x6b   : > { %s216_s10 = sand.u32 7, %s1287_s18  ;;  %s667_s19 = sshll.u32 %s213_s16, 4  ;;  %v378_v7 = vld [vmem:[#allocation8 + $0x158] sm:$0xff]  ;;  %v725_v8 = vpack.c.bf16 %v373_v5, %v371_v4  ;;  %v375_v10 = vld [vmem:[#allocation8 + $0x140] sm:$0xff]  ;;  %v377_v11 = vld [vmem:[#allocation8 + $0x150] sm:$0xff] }
  0x6c   : > { %s1140_s26 = sadd.s32 %s667_s19, %s216_s10  ;;  %p615_p9 = scmp.lt.s32.totalorder %s1120_s24, 31  ;;  %v727_v9 = vpack.c.bf16 %v378_v7, %v376_v6  ;;  %v380_v12 = vld [vmem:[#allocation8 + $0x168] sm:$0xff]  ;;  %v382_v13 = vld [vmem:[#allocation8 + $0x178] sm:$0xff]  ;;  %v729_v14 = vpack.c.bf16 %v377_v11, %v375_v10  ;;  %v379_v16 = vld [vmem:[#allocation8 + $0x160] sm:$0xff] }
  0x6d   : > { %s1289_s24 = smov (!%p227_p8, %s1120_s24), 0  ;;  %p245_p12 = scmp.gt.s32.totalorder %s1123_s27, 0  ;;  %v731_v15 = vpack.c.bf16 %v382_v13, %v380_v12  ;;  %v381_v17 = vld [vmem:[#allocation8 + $0x170] sm:$0xff]  ;;  %v384_v18 = vld [vmem:[#allocation8 + $0x188] sm:$0xff]  ;;  %v383_v23 = vld [vmem:[#allocation8 + $0x180] sm:$0xff] }
  0x6e   : > { %p622_p13 = scmp.lt.s32.totalorder %s1123_s27, 31  ;;  %s1291_s24 = smov (!%p615_p9, %s1289_s24), 31  ;;  %v385_v24 = vld [vmem:[#allocation8 + $0x190] sm:$0xff]  ;;  %v388_v25 = vld [vmem:[#allocation8 + $0x1a8] sm:$0xff]  ;;  %v390_v26 = vld [vmem:[#allocation8 + $0x1b8] sm:$0xff] }
  0x6f   : > { %s246_s5 = scalar_select %p245_p12, %s1123_s27, 0  ;;  %v391_v35 = vld [vmem:[#allocation8 + $0x1c0] sm:$0xff]  ;;  %v393_v36 = vld [vmem:[#allocation8 + $0x1d0] sm:$0xff] }
  0x70   : > { %s231_s18 = sshra.s32 %s1291_s24, 3  ;;  %s234_s6 = sand.u32 7, %s1291_s24  ;;  %v395_v41 = vld [vmem:[#allocation8 + $0x1e0] sm:$0xff]  ;;  %v397_v42 = vld [vmem:[#allocation8 + $0x1f0] sm:$0xff] }
  0x71   : > { %s670_s11 = sshll.u32 %s231_s18, 4  ;;  %p263_p2 = scmp.gt.s32.totalorder %s1126_s9, 0  ;;  %698 = vmatpush1.bf16.xpose.msra.mxu0 %v697_v20  ;;  %v386_v20 = vld [vmem:[#allocation8 + $0x198] sm:$0xff]  ;;  %v749_v43 = vpack.c.bf16 %v397_v42, %v395_v41  ;;  %v399_v47 = vld [vmem:[%s1258_s3] sm:$0x3] }
  0x72   : > { %s237_s14 = sadd.s32 %s670_s11, %s234_s6  ;;  %p629_p4 = scmp.lt.s32.totalorder %s1126_s9, 31  ;;  %700 = vmatprep.subr.bf16.mxu0 %v699_v21  ;;  %v733_v21 = vpack.c.bf16 %v381_v17, %v379_v16  ;;  %v735_v22 = vpack.c.bf16 %v386_v20, %v384_v18 }
  0x73   : > { %p281_p10 = scmp.gt.s32.totalorder %s1129_s12, 0  ;;  %s1293_s5 = smov (!%p622_p13, %s246_s5), 31 }
  0x74   : > { %s199_s24 = scalar_lea.vmem [#allocation5], %s1138_s17  ;;  %s220_s7 = scalar_lea.vmem [#allocation5], %s1140_s26 }
  0x75   : > { %v200_v27 = vld [vmem:[%s199_s24] ss:$8 sm:$0x3]  ;;  %s264_s15 = scalar_select %p263_p2, %s1126_s9, 0 }
  0x76   : > { %205 = vst.msk [vmem:[#allocation2] ss:$8 sm:$0x3] %vm1151_vm0, %v200_v27  ;;  %v221_v28 = vld [vmem:[%s220_s7] ss:$8 sm:$0x3]  ;;  %v737_v27 = vpack.c.bf16 %v385_v24, %v383_v23 }
  0x77   : > { %s238_s16 = scalar_lea.vmem [#allocation5], %s237_s14  ;;  %223 = vst.msk [vmem:[#allocation2 + $0x1] ss:$8 sm:$0x3] %vm1151_vm0, %v221_v28  ;;  %s249_s27 = sshra.s32 %s1293_s5, 3  ;;  %v739_v28 = vpack.c.bf16 %v390_v26, %v388_v25 }
  0x78   : > { %v239_v29 = vld [vmem:[%s238_s16] ss:$8 sm:$0x3]  ;;  %s252_s17 = sand.u32 7, %s1293_s5  ;;  %s673_s10 = sshll.u32 %s249_s27, 4 }
  0x79   : > { %241 = vst.msk [vmem:[#allocation2 + $0x2] ss:$8 sm:$0x3] %vm1151_vm0, %v239_v29  ;;  %p636_p5 = scmp.lt.s32.totalorder %s1129_s12, 31  ;;  %s255_s19 = sadd.s32 %s673_s10, %s252_s17  ;;  %702 = vmatpush1.bf16.xpose.msra.mxu0 %v701_v30  ;;  %v387_v29 = vld [vmem:[#allocation8 + $0x1a0] sm:$0xff]  ;;  %v389_v30 = vld [vmem:[#allocation8 + $0x1b0] sm:$0xff] }
  0x7a   : > { %s1172_s26 = sld [smem:[#allocation4 + %s297_s13]]  ;;  %s315_s18 = sadd.s32 7, %s1111_s8  ;;  %704 = vmatprep.subr.bf16.mxu0 %v703_v31  ;;  %v392_v31 = vld [vmem:[#allocation8 + $0x1c8] sm:$0xff]  ;;  %v741_v33 = vpack.c.bf16 %v389_v30, %v387_v29 }
  0x7b   : > { %s256_s6 = scalar_lea.vmem [#allocation5], %s255_s19  ;;  %s1295_s15 = smov (!%p629_p4, %s264_s15), 31 }
  0x7c   : > { %v257_v32 = vld [vmem:[%s256_s6] ss:$8 sm:$0x3]  ;;  %s282_s5 = scalar_select %p281_p10, %s1129_s12, 0 }
  0x7d   : > { %259 = vst.msk [vmem:[#allocation2 + $0x3] ss:$8 sm:$0x3] %vm1151_vm0, %v257_v32  ;;  %s267_s13 = sshra.s32 %s1295_s15, 3  ;;  %s270_s11 = sand.u32 7, %s1295_s15  ;;  %v394_v32 = vld [vmem:[#allocation8 + $0x1d8] sm:$0xff] }
  0x7e   : > { %s676_s8 = sshll.u32 %s267_s13, 4  ;;  %s1182_s14 = sld [smem:[#allocation4 + %s315_s18]]  ;;  %v743_v34 = vpack.c.bf16 %v394_v32, %v392_v31 }
  0x7f   : > { %s273_s9 = sadd.s32 %s676_s8, %s270_s11  ;;  %s1297_s5 = smov (!%p636_p5, %s282_s5), 31 }
  0x80   : > { %p299_p11 = scmp.gt.s32.totalorder %s1172_s26, 0  ;;  %p643_p0 = scmp.lt.s32.totalorder %s1172_s26, 31 }
  0x81   : > { %s274_s24 = scalar_lea.vmem [#allocation5], %s273_s9  ;;  %s285_s7 = sshra.s32 %s1297_s5, 3  ;;  %706 = vmatpush1.bf16.xpose.msra.mxu0 %v705_v37  ;;  %v396_v37 = vld [vmem:[#allocation8 + $0x1e8] sm:$0xff] }
  0x82   : > { %v275_v39 = vld [vmem:[%s274_s24] ss:$8 sm:$0x3]  ;;  %s300_s15 = scalar_select %p299_p11, %s1172_s26, 0  ;;  %708 = vmatprep.subr.bf16.mxu0 %v707_v38 }
  0x83   : > { %277 = vst.msk [vmem:[#allocation2 + $0x4] ss:$8 sm:$0x3] %vm1151_vm0, %v275_v39  ;;  %s288_s16 = sand.u32 7, %s1297_s5  ;;  %s679_s27 = sshll.u32 %s285_s7, 4  ;;  %v398_v38 = vld [vmem:[#allocation8 + $0x1f8] sm:$0xff]  ;;  %v745_v39 = vpack.c.bf16 %v393_v36, %v391_v35 }
  0x84   : > { %p317_p3 = scmp.gt.s32.totalorder %s1182_s14, 0  ;;  %s291_s17 = sadd.s32 %s679_s27, %s288_s16  ;;  %v747_v40 = vpack.c.bf16 %v398_v38, %v396_v37 }
  0x85   : > { %p650_p1 = scmp.lt.s32.totalorder %s1182_s14, 31  ;;  %s292_s12 = scalar_lea.vmem [#allocation5], %s291_s17 }
  0x86   : > { %v293_v44 = vld [vmem:[%s292_s12] ss:$8 sm:$0x3]  ;;  %s1299_s15 = smov (!%p643_p0, %s300_s15), 31  ;;  %s686_s27 = sshll.u32 %s1011_s23, 8 }
  0x87   : > { %295 = vst.msk [vmem:[#allocation2 + $0x5] ss:$8 sm:$0x3] %vm1151_vm0, %v293_v44  ;;  %s318_s10 = scalar_select %p317_p3, %s1182_s14, 0 }
  0x88   : > { %s303_s19 = sshra.s32 %s1299_s15, 3  ;;  %s306_s18 = sand.u32 7, %s1299_s15 }
  0x89   : > { %s682_s6 = sshll.u32 %s303_s19, 4  ;;  %710 = vmatpush1.bf16.xpose.msra.mxu0 %v709_v45  ;;  %s1301_s10 = smov (!%p650_p1, %s318_s10), 31  ;;  %v402_v45 = vshrl.u32 %v201_v19, 7 }
  0x8a   : > { %s309_s5 = sadd.s32 %s682_s6, %s306_s18  ;;  %712 = vmatprep.subr.bf16.mxu0 %v711_v46  ;;  %s321_s26 = sshra.s32 %s1301_s10, 3 }
  0x8b   : > { %s310_s13 = scalar_lea.vmem [#allocation5], %s309_s5  ;;  %s324_s11 = sand.u32 7, %s1301_s10  ;;  %v403_v46 = vsub.s32 0, %v402_v45  ;;  %v407_v48 = vsub.s32 1, %v402_v45 }
  0x8c   : > { %v311_v49 = vld [vmem:[%s310_s13] ss:$8 sm:$0x3]  ;;  %s685_s8 = sshll.u32 %s321_s26, 4  ;;  %s183_s14 = sand.u32 1, %s946_s0  }
  0x8d   : > { %313 = vst.msk [vmem:[#allocation2 + $0x6] ss:$8 sm:$0x3] %vm1151_vm0, %v311_v49  ;;  %s327_s9 = sadd.s32 %s685_s8, %s324_s11  ;;  %s599_s15 = sshll.u32 %s183_s14, 4  ;;  %v404_v49 = vrot.slane %v399_v47, %v403_v46  ;;  %v408_v50 = vrot.slane %v399_v47, %v407_v48 }
  0x8e   : > { %s328_s24 = scalar_lea.vmem [#allocation5], %s327_s9  ;;  %s185_s17 = scalar_lea.vmem [#allocation10], %s599_s15 }
  0x8f   : > { %v329_v54 = vld [vmem:[%s328_s24] ss:$8 sm:$0x3]  ;;  %s499_s12 = sshll.u32 %s185_s17, 4  ;;  %s1213_s18 = scalar_lea.hbm %s1259_s4, %s686_s27  ;;  %s1215_s12 = int_to_ptr.vmem [resolvable:$true] %s499_s12 }
  0x90   : > { %331 = vst.msk [vmem:[#allocation2 + $0x7] ss:$8 sm:$0x3] %vm1151_vm0, %v329_v54  ;;  %s485_s6 = scalar_lea.sflag [#allocation7], %s183_s14  ;;  %s882_s23 = scalar_lea.vmem %s1215_s12, 256 }
  0x91   : > { %714 = vmatpush1.bf16.xpose.msra.mxu0 %v713_v52  ;;  %p883_p6 = scmp.ne.s32.totalorder %s1215_s12, %s882_s23  ;;  %p1274_p7 = scmp.ne.s32.totalorder %s1263_s29, 0 }
  0x92   : > { %716 = vmatprep.subr.bf16.mxu0 %v715_v53  ;;  %s961_s5 = smov [#allocation10]  }
  0x93   : > { %p884_p8 = pnand %p883_p6, %p1274_p7  ;;  %s886_s13 = sshll.u32 %s961_s5, 4  ;;  %s887_s13 = int_to_ptr.vmem [resolvable:$false] %s886_s13 }
  0x94   : > { %s888_s26 = scalar_lea.vmem %s887_s13, 512  ;;  %p889_p12 = scmp.lt.s32.totalorder %s1215_s12, %s887_s13 }
  0x95   : > { %p885_p9 = pneg %p884_p8  ;;  %p890_p13 = scmp.lt.s32.totalorder %s888_s26, %s882_s23 }
  0x97   : > { %v334_v61 = vld [vmem:[#allocation2 + $0x8] sm:$0xff]  ;;  %v333_v44 = vld [vmem:[#allocation2] sm:$0xff]  ;;  %p891_p2 = por %p890_p13, %p889_p12 }
  0x98   : > { %475 = vmatprep.mubr.f32.mxu0 %v334_v61 }
  0x99   : > { %718 = vmatpush1.bf16.xpose.msra.mxu0 %v717_v59  ;;  %p892_p4 = pnand %p891_p2, %p885_p9 }
  0x9a   : > { %720 = vmatprep.subr.bf16.mxu0 %v719_v60 }
  0xa1   : > { %722 = vmatpush1.bf16.xpose.msra.mxu0 %v721_v2 }
  0xa2   : > { %724 = vmatprep.subr.bf16.mxu0 %v723_v3 }
  0xa9   : > { %726 = vmatpush1.bf16.xpose.msra.mxu0 %v725_v8 }
  0xaa   : > { %728 = vmatprep.subr.bf16.mxu0 %v727_v9 }
  0xb1   : > { %730 = vmatpush1.bf16.xpose.msra.mxu0 %v729_v14 }
  0xb2   : > { %732 = vmatprep.subr.bf16.mxu0 %v731_v15 }
  0xb9   : > { %734 = vmatpush1.bf16.xpose.msra.mxu0 %v733_v21 }
  0xba   : > { %736 = vmatprep.subr.bf16.mxu0 %v735_v22 }
  0xc1   : > { %738 = vmatpush1.bf16.xpose.msra.mxu0 %v737_v27 }
  0xc2   : > { %740 = vmatprep.subr.bf16.mxu0 %v739_v28 }
  0xc9   : > { %742 = vmatpush1.bf16.xpose.msra.mxu0 %v741_v33 }
  0xca   : > { %744 = vmatprep.subr.bf16.mxu0 %v743_v34 }
  0xd1   : > { %746 = vmatpush1.bf16.xpose.msra.mxu0 %v745_v39 }
  0xd2   : > { %748 = vmatprep.subr.bf16.mxu0 %v747_v40 }
  0xd9   : > { %750 = vmatpush1.bf16.xpose.msra.mxu0 %v749_v43 }
  0xe0   : > { %476 = vmatmul.mubr.f32.vlgmr.msra.gmra.mrb[0].mxu0 %v333_v44 }
 0x1b3   : > { %v477_v51 = vpop.f32.mrb[0].mxu0 }
 0x1b4   : > { %v478_v52 = vadd.f32 %v477_v51, %v404_v49  ;;  %v479_v53 = vpop.f32.mrb[1].mxu0 }
 0x1b5   : > { %v480_v54 = vadd.f32 %v479_v53, %v408_v50 }
 0x1b6   : > { %482 = vst [vmem:[%s185_s17] sm:$0xff] %v478_v52 }
 0x1b7   : > { %483 = vst [vmem:[%s185_s17 + $0x8] sm:$0xff] %v480_v54 }
 0x1b8   : > { %895 = shalt.err (!%p892_p4)
}
 0x1b9   : > { %s896_s11 = scalar_lea.hbm %s1213_s18, 256  ;;  %s900_s24 = scalar_lea.hbm %s1259_s4, 512 }
 0x1ba   : > { %p897_p10 = scmp.ne.s32.totalorder %s1213_s18, %s896_s11  ;;  %p901_p0 = scmp.lt.u32.totalorder %s1213_s18, %s1259_s4 }
 0x1bb   : > { %p902_p3 = scmp.lt.u32.totalorder %s900_s24, %s896_s11  ;;  %p904_p6 = scmp.lt.u32.totalorder %s896_s11, %s1213_s18 }
 0x1bc   : > { %p898_p5 = pnand %p897_p10, %p1274_p7 }
 0x1bd   : > { %p903_p1 = por %p902_p3, %p901_p0 }
 0x1be   : > { %p899_p11 = pneg %p898_p5 }
 0x1bf   : > { %p905_p8 = por %p904_p6, %p903_p1 }
 0x1c1   : > { %p906_p9 = pnand %p905_p8, %p899_p11 }
 0x1c3   : > { %909 = shalt.err (!%p906_p9)
}
 0x1c4   : > { %759 = dma.vmem_to_hbm [thread:$0]  (%p1274_p7), %s1215_s12, 256, %s1213_s18, %s485_s6  }
 0x1c5 PF: > { %p776_p12 = scmp.ge.s32.totalorder %s954_s22, 2  ;;  %s511_s7 = sand.u32 1, %s942_s20  }
 0x1c6   : > { %p1275_p13 = scmp.ne.s32.totalorder %s1264_s30, 0  ;;  %s512_s16 = scalar_lea.sflag [#allocation7], %s511_s7 }
 0x1c8   : > { %p769_p2 = pnand %p776_p12, %p1275_p13 }
 0x1ca   : > { %937 = dma.done.wait (!%p769_p2), %s512_s16, 256  }
 0x1cb   : > { %939 = vsyncadd (!%p769_p2), %s512_s16, 4294967040  ;;  %p22_p4 = scmp.ge.s32.totalorder %s1015_s25, 4   ;;  %s1276_s20 = smov %s946_s0 }
 0x1cc   : > { %s1277_s0 = smov %s950_s21  ;;  %s1278_s21 = smov %s1026_s28 }
 0x1cd   : > { %s1279_s22 = smov %s1015_s25  ;;  %24 = sbr.rel (!%p22_p4) target bundleno = 20 (0x14), region = 88 }
 0x1d4   :  { %517 = vsyncpa [#allocation6], 1 }
 0x1d5   :  { %519 = vsyncpa [#allocation6 + $0x1], 1 }
 0x1d6   :  { %520 = vsyncpa [#allocation9], 1 }
 0x1d7   :  { %521 = vsyncpa [#allocation7], 1 }
 0x1d8   :  { %523 = vsyncpa [#allocation7 + $0x1], 1 }

</bundles_post_ra>
